<compile_context>
chip_gen: v6e
topology: v6e:2x2x1
jax: 0.10.0
libtpu: 0.0.40
codegen_flags: <defaults>
</compile_context>

<pallas_src>
import jax
import jax.numpy as jnp
from jax.experimental import pallas as pl
from jax.experimental.pallas import tpu as pltpu

KH = KW = 4  # conv kernel size (fixed by the module)


# --------------------------------------------------------------------------
# Fast path: H == W == 4 (canonical DCGAN case) -> single 4x4 VALID window,
# so the conv is exactly a matvec over K = C*16 with patches = x.reshape(B, K).
# --------------------------------------------------------------------------
def _matvec_sigmoid_kernel(p_ref, w_ref, o_ref):
    """p_ref: (TM, K) patch tile in its native dtype, w_ref: (K, 1) flattened
    conv weight, o_ref: (TM, 1) f32 = sigmoid(p @ w).  bf16 cast happens here
    (free on the VPU slot); f32 accumulation on the MXU; sigmoid fused."""
    p = p_ref[...].astype(jnp.bfloat16)
    w = w_ref[...].astype(jnp.bfloat16)
    acc = jnp.dot(p, w, preferred_element_type=jnp.float32)
    o_ref[...] = jax.nn.sigmoid(acc)


def _round_down8(v):
    return (v // 8) * 8


def _fast_path_tiling(m, k, in_itemsize):
    """Pick rows-per-grid-step TM, number of tiles and an explicit scoped-VMEM
    limit sized from the actual buffers."""
    m8 = ((m + 7) // 8) * 8

    # per-generation input-tile byte budget (conservative default is v7x-safe)
    tile_bytes = 8 * 1024 * 1024
    big_vmem = False
    try:
        if pltpu.get_tpu_info().vmem_capacity_bytes >= 96 * 1024 * 1024:
            big_vmem = True              # v5e / v6e: 128 MiB physical VMEM
            tile_bytes = 16 * 1024 * 1024
    except Exception:
        pass

    tm = _round_down8(tile_bytes // max(1, k * in_itemsize))
    # Guarantee >= 4 grid steps when M allows: 2 tiles per TensorCore on v7x
    # (otherwise one core idles) and pipeline overlap on v5e/v6e.
    quarter = _round_down8(m8 // 4)
    tm = min(tm, max(8, quarter))
    tm = max(8, min(tm, m8))
    num_tiles = pl.cdiv(m, tm)

    # Explicit VMEM budget: 2x input tile, 2x lane-padded (K,1) weight block,
    # 2x lane-padded (TM,1) output block, in-kernel bf16 temp, headroom.
    in_buf = tm * k * in_itemsize
    bf16_tmp = tm * k * 2
    w_buf = k * 128 * 4            # (K,1) f32 lane-pads to 128 lanes
    out_buf = tm * 128 * 4         # (TM,1) f32 lane-pads to 128 lanes
    vmem_limit = 2 * (in_buf + w_buf + out_buf) + bf16_tmp + (4 << 20)
    cap = (100 << 20) if big_vmem else (56 << 20)
    vmem_limit = int(min(max(vmem_limit, 16 << 20), cap))
    return tm, num_tiles, vmem_limit


def _forward_1x1(x, weight, B, C):
    K = C * KH * KW
    # (c, h, w) flattening of a 4x4 image == (c, kh, kw) weight flattening:
    # zero-copy reshape, no im2col, no dtype convert.
    patches = x.reshape(B, K)
    w_col = weight.reshape(K, 1)
    itemsize = x.dtype.itemsize
    TM, num_tiles, vmem_limit = _fast_path_tiling(B, K, itemsize)

    out = pl.pallas_call(
        _matvec_sigmoid_kernel,
        out_shape=jax.ShapeDtypeStruct((B, 1), jnp.float32),
        grid_spec=pltpu.PrefetchScalarGridSpec(
            num_scalar_prefetch=0,
            grid=(num_tiles,),
            in_specs=[
                pl.BlockSpec((TM, K), lambda i: (i, 0)),   # streamed patch tiles
                pl.BlockSpec((K, 1), lambda i: (0, 0)),    # weight, resident
            ],
            out_specs=pl.BlockSpec((TM, 1), lambda i: (i, 0)),
        ),
        compiler_params=pltpu.CompilerParams(
            dimension_semantics=("parallel",),
            vmem_limit_bytes=vmem_limit,
        ),
        cost_estimate=pl.CostEstimate(
            flops=2 * B * K,
            transcendentals=B,
            bytes_accessed=B * K * itemsize + K * itemsize + B * 4,
        ),
    )(patches, w_col)
    return out.reshape(B, 1, 1, 1)


# --------------------------------------------------------------------------
# General path: H, W > 4.  Fused in-kernel window gather: one batch element
# per grid step, 16 accumulated taps, no HBM im2col / transpose round trip.
# --------------------------------------------------------------------------
def _conv4x4_sigmoid_kernel(x_ref, w_ref, o_ref):
    """x_ref: (1, C, H, W), w_ref: (1, C, 4, 4), o_ref: (1, 1, OH, OW) f32."""
    _, _, oh, ow = o_ref.shape
    xb = x_ref[...][0].astype(jnp.float32)    # (C, H, W)
    wb = w_ref[...][0].astype(jnp.float32)    # (C, 4, 4)
    acc = jnp.zeros((oh, ow), jnp.float32)
    for kh in range(KH):                      # 16 static taps
        for kw in range(KW):
            xs = xb[:, kh:kh + oh, kw:kw + ow]      # (C, OH, OW) static slice
            wv = wb[:, kh, kw][:, None, None]       # (C, 1, 1)
            acc = acc + jnp.sum(xs * wv, axis=0)
    o_ref[...] = jax.nn.sigmoid(acc).reshape(1, 1, oh, ow)


def _forward_general(x, weight, B, C, H, W, OH, OW):
    itemsize = x.dtype.itemsize
    pad8 = lambda v: ((v + 7) // 8) * 8
    pad128 = lambda v: ((v + 127) // 128) * 128
    x_blk = C * pad8(H) * pad128(W) * itemsize
    w_blk = C * pad8(KH) * pad128(KW) * weight.dtype.itemsize
    o_blk = pad8(OH) * pad128(OW) * 4
    vmem_limit = int(min(max(2 * (x_blk + w_blk + o_blk) + (4 << 20), 16 << 20),
                         56 << 20))
    # TODO(synk): tile the channel axis for very large C*H*W feature maps; the
    # module's intended input is ndf*8 channels at 4x4 spatial, so one whole
    # image per grid step fits VMEM comfortably here.

    return pl.pallas_call(
        _conv4x4_sigmoid_kernel,
        out_shape=jax.ShapeDtypeStruct((B, 1, OH, OW), jnp.float32),
        grid_spec=pltpu.PrefetchScalarGridSpec(
            num_scalar_prefetch=0,
            grid=(B,),
            in_specs=[
                pl.BlockSpec((1, C, H, W), lambda b: (b, 0, 0, 0)),
                pl.BlockSpec((1, C, KH, KW), lambda b: (0, 0, 0, 0)),
            ],
            out_specs=pl.BlockSpec((1, 1, OH, OW), lambda b: (b, 0, 0, 0)),
        ),
        compiler_params=pltpu.CompilerParams(
            dimension_semantics=("parallel",),
            vmem_limit_bytes=vmem_limit,
        ),
        cost_estimate=pl.CostEstimate(
            flops=2 * B * OH * OW * C * KH * KW,
            transcendentals=B * OH * OW,
            bytes_accessed=(B * C * H * W * itemsize
                            + C * KH * KW * weight.dtype.itemsize
                            + B * OH * OW * 4),
        ),
    )(x, weight)


# --------------------------------------------------------------------------
# Public forward
# --------------------------------------------------------------------------
def discriminator_c_forward(x, weight):
    """x: (B, C, H, W), weight: (1, C, 4, 4) (PyTorch OIHW).
    Returns (B, 1, H-3, W-3) f32 == sigmoid(conv2d(x, weight, stride=1, VALID))."""
    B, C, H, W = x.shape
    assert weight.shape == (1, C, KH, KW)
    OH, OW = H - KH + 1, W - KW + 1
    assert OH >= 1 and OW >= 1, "spatial dims must be >= 4"
    if OH == 1 and OW == 1:
        return _forward_1x1(x, weight, B, C)
    return _forward_general(x, weight, B, C, H, W, OH, OW)


def _reference(x, weight, compute_dtype):
    """XLA reference with the same operand-dtype policy as the kernel path."""
    y = jax.lax.conv_general_dilated(
        x.astype(compute_dtype), weight.astype(compute_dtype),
        window_strides=(1, 1), padding="VALID",
        dimension_numbers=("NCHW", "OIHW", "NCHW"),
        preferred_element_type=jnp.float32)
    return jax.nn.sigmoid(y)


if __name__ == "__main__":
    # Small-but-consistent shapes: ndf=8 -> in_channels = ndf*8 = 64.
    ndf = 8
    B, C = 2, ndf * 8

    key = jax.random.PRNGKey(0)
    kx1, kx2, kw = jax.random.split(key, 3)
    weight = 0.02 * jax.random.normal(kw, (1, C, KH, KW), dtype=jnp.float32)

    # 1) Canonical DCGAN case: 4x4 spatial -> 1x1 output (tiled matvec kernel).
    x1 = jax.random.normal(kx1, (B, C, 4, 4), dtype=jnp.float32)
    out1 = jax.block_until_ready(discriminator_c_forward(x1, weight))
    assert out1.shape == (B, 1, 1, 1)
    assert jnp.allclose(out1, _reference(x1, weight, jnp.bfloat16),
                        atol=2e-3, rtol=2e-3)

    # 2) General case: 6x6 spatial -> 3x3 output (fused window-gather kernel).
    x2 = jax.random.normal(kx2, (B, C, 6, 6), dtype=jnp.float32)
    out2 = jax.block_until_ready(discriminator_c_forward(x2, weight))
    assert out2.shape == (B, 1, 3, 3)
    assert jnp.allclose(out2, _reference(x2, weight, jnp.float32),
                        atol=2e-3, rtol=2e-3)

    print("KERNEL_OK")
</pallas_src>

<mosaic_0001>
module attributes {stable_mosaic.version = 11 : i64} {
  func.func @_matvec_sigmoid_kernel(%arg0: i32, %arg1: memref<8x1024xf32, #tpu.memory_space<vmem>>, %arg2: memref<1024x1xf32, #tpu.memory_space<vmem>>, %arg3: memref<8x1xf32, #tpu.memory_space<vmem>>) attributes {dimension_semantics = [#tpu.dimension_semantics<parallel>], iteration_bounds = array<i64: 1>, scalar_prefetch = 0 : i64, scratch_operands = 0 : i64, tpu.core_type = #tpu.core_type<tc>, window_params = [{transform_indices = @transform_0, window_bounds = array<i64: 8, 1024>}, {pipeline_mode = #tpu.pipeline_mode<synchronous>, transform_indices = @transform_1, window_bounds = array<i64: 1024, 1>}, {transform_indices = @transform_2, window_bounds = array<i64: 8, 1>}]} {
    %c0 = arith.constant 0 : index
    %c0_0 = arith.constant 0 : index
    %0 = vector.load %arg1[%c0, %c0_0] : memref<8x1024xf32, #tpu.memory_space<vmem>>, vector<8x1024xf32>
    %1 = arith.truncf %0 : vector<8x1024xf32> to vector<8x1024xbf16>
    %c0_1 = arith.constant 0 : index
    %c0_2 = arith.constant 0 : index
    %2 = vector.load %arg2[%c0_1, %c0_2] : memref<1024x1xf32, #tpu.memory_space<vmem>>, vector<1024x1xf32>
    %3 = arith.truncf %2 : vector<1024x1xf32> to vector<1024x1xbf16>
    %cst = arith.constant dense<0.000000e+00> : vector<8x1xf32>
    %4 = tpu.matmul %1, %3, %cst {dimension_numbers = #tpu.dot_dimension_numbers<[1], [0], [0], [1], [0, 0, 1, 1], [], []>} : vector<8x1024xbf16>, vector<1024x1xbf16>, vector<8x1xf32> -> vector<8x1xf32>
    %5 = arith.negf %4 : vector<8x1xf32>
    %6 = math.exp %5 : vector<8x1xf32>
    %cst_3 = arith.constant 1.000000e+00 : f32
    %7 = vector.broadcast %cst_3 : f32 to vector<8x1xf32>
    %8 = arith.addf %7, %6 : vector<8x1xf32>
    %9 = arith.divf %7, %8 : vector<8x1xf32>
    %c0_4 = arith.constant 0 : index
    %c0_5 = arith.constant 0 : index
    %10 = vector.load %arg3[%c0_4, %c0_5] : memref<8x1xf32, #tpu.memory_space<vmem>>, vector<8x1xf32>
    tpu.vector_store %arg3[%c0_4, %c0_5], %9 {strides = array<i32>} : memref<8x1xf32, #tpu.memory_space<vmem>>, vector<8x1xf32>,
    return
  }
  func.func @transform_0(%arg0: i32) -> (i32, i32) {
    %c0_i32 = arith.constant 0 : i32
    %c0_i32_0 = arith.constant 0 : i32
    return %arg0, %c0_i32 : i32, i32
  }
  func.func @transform_1(%arg0: i32) -> (i32, i32) {
    %c0_i32 = arith.constant 0 : i32
    %c0_i32_0 = arith.constant 0 : i32
    %c0_i32_1 = arith.constant 0 : i32
    return %c0_i32, %c0_i32_0 : i32, i32
  }
  func.func @transform_2(%arg0: i32) -> (i32, i32) {
    %c0_i32 = arith.constant 0 : i32
    %c0_i32_0 = arith.constant 0 : i32
    return %arg0, %c0_i32 : i32, i32
  }
}

</mosaic_0001>

<bundles_post_ra>
// kernel: tpu_custom_call.1
= control target key start
LH: loop header
LB: loop body
LE: loop exit
PB: predicated region body
PF: predicated region fallthrough
CT: control target
= control target key end

     0   :  { %v623_v51 = vmov 1983009808   ;;  %v35_v53 = vlaneseq  ;;  %vm474_vm0 = vcmask 7168   ;;  %s1060_s0 = inlined_call_operand.vmem [shape: f32[2,1024], index: 0, kind: input, shape index: {}]   ;;  %s1061_s1 = inlined_call_operand.vmem [shape: f32[1024,1], index: 1, kind: input, shape index: {}]   ;;  %s1062_s2 = inlined_call_operand.vmem [shape: f32[2,1], index: 2, kind: output, shape index: {}]  }
   0x1   :  { %v146_v0 = vld [vmem:[%s1061_s1 + $0xf0] sm:$0xff]  ;;  %v147_v1 = vld [vmem:[%s1061_s1 + $0xf8] sm:$0xff]  ;;  %v144_v11 = vld [vmem:[%s1061_s1 + $0xe0] sm:$0xff]  ;;  %v33_v52 = vunpack.c.l.s4 %v623_v51 }
   0x2   :  { %v178_v2 = vld [vmem:[%s1061_s1 + $0x1f0] sm:$0xff]  ;;  %v259_v3 = vpack.c.bf16 %v147_v1, %v146_v0  ;;  %v179_v4 = vld [vmem:[%s1061_s1 + $0x1f8] sm:$0xff]  ;;  %v145_v13 = vld [vmem:[%s1061_s1 + $0xe8] sm:$0xff] }
   0x3   :  { %v130_v5 = vld [vmem:[%s1061_s1 + $0x70] sm:$0xff]  ;;  %v131_v6 = vld [vmem:[%s1061_s1 + $0x78] sm:$0xff]  ;;  %v275_v7 = vpack.c.bf16 %v179_v4, %v178_v2  ;;  %v176_v14 = vld [vmem:[%s1061_s1 + $0x1e0] sm:$0xff]  ;;  %v258_v16 = vpack.c.bf16 %v145_v13, %v144_v11  ;;  %v34_v4 = vunpack.c.0.s8 %v33_v52 }
   0x4   :  { %v251_v8 = vpack.c.bf16 %v131_v6, %v130_v5  ;;  %v162_v9 = vld [vmem:[%s1061_s1 + $0x170] sm:$0xff]  ;;  %v163_v10 = vld [vmem:[%s1061_s1 + $0x178] sm:$0xff]  ;;  %518 = vmatprep.subr.bf16.mxu0 %v259_v3  ;;  %v177_v15 = vld [vmem:[%s1061_s1 + $0x1e8] sm:$0xff]  ;;  %v36_v5 = vshrl.u32 %v35_v53, 7 }
   0x5   :  { %v267_v12 = vpack.c.bf16 %v163_v10, %v162_v9  ;;  %540 = vmatprep.subr.bf16.mxu1 %v275_v7  ;;  %v274_v17 = vpack.c.bf16 %v177_v15, %v176_v14  ;;  %v128_v18 = vld [vmem:[%s1061_s1 + $0x60] sm:$0xff]  ;;  %v129_v19 = vld [vmem:[%s1061_s1 + $0x68] sm:$0xff]  ;;  %v142_v23 = vld [vmem:[%s1061_s1 + $0xd0] sm:$0xff] }
   0x6   :  { %519 = vmatpush3.bf16.msra.mxu0 %v251_v8  ;;  %v160_v20 = vld [vmem:[%s1061_s1 + $0x160] sm:$0xff]  ;;  %v250_v21 = vpack.c.bf16 %v129_v19, %v128_v18  ;;  %v161_v22 = vld [vmem:[%s1061_s1 + $0x168] sm:$0xff]  ;;  %v143_v24 = vld [vmem:[%s1061_s1 + $0xd8] sm:$0xff] }
   0x7   :  { %541 = vmatpush3.bf16.msra.mxu1 %v267_v12  ;;  %520 = vmatprep.subr.bf16.mxu0 %v258_v16  ;;  %v266_v25 = vpack.c.bf16 %v161_v22, %v160_v20  ;;  %v257_v26 = vpack.c.bf16 %v143_v24, %v142_v23  ;;  %v174_v27 = vld [vmem:[%s1061_s1 + $0x1d0] sm:$0xff]  ;;  %v175_v28 = vld [vmem:[%s1061_s1 + $0x1d8] sm:$0xff]  ;;  %v140_v35 = vld [vmem:[%s1061_s1 + $0xc0] sm:$0xff]  ;;  %v813_v22 = vsub.s32 %v34_v4, %v36_v5 }
   0x8   :  { %542 = vmatprep.subr.bf16.mxu1 %v274_v17  ;;  %v126_v29 = vld [vmem:[%s1061_s1 + $0x50] sm:$0xff]  ;;  %v273_v30 = vpack.c.bf16 %v175_v28, %v174_v27  ;;  %v127_v31 = vld [vmem:[%s1061_s1 + $0x58] sm:$0xff]  ;;  %v141_v36 = vld [vmem:[%s1061_s1 + $0xc8] sm:$0xff] }
   0x9   :  { %v158_v32 = vld [vmem:[%s1061_s1 + $0x150] sm:$0xff]  ;;  %v159_v33 = vld [vmem:[%s1061_s1 + $0x158] sm:$0xff]  ;;  %v249_v34 = vpack.c.bf16 %v127_v31, %v126_v29  ;;  %v172_v37 = vld [vmem:[%s1061_s1 + $0x1c0] sm:$0xff]  ;;  %v256_v39 = vpack.c.bf16 %v141_v36, %v140_v35 }
   0xa   :  { %521 = vmatpush3.bf16.msra.mxu0 %v250_v21  ;;  %v265_v38 = vpack.c.bf16 %v159_v33, %v158_v32  ;;  %v173_v40 = vld [vmem:[%s1061_s1 + $0x1c8] sm:$0xff]  ;;  %v124_v41 = vld [vmem:[%s1061_s1 + $0x40] sm:$0xff]  ;;  %v138_v46 = vld [vmem:[%s1061_s1 + $0xb0] sm:$0xff] }
   0xb   :  { %543 = vmatpush3.bf16.msra.mxu1 %v266_v25  ;;  %522 = vmatprep.subr.bf16.mxu0 %v257_v26  ;;  %v125_v42 = vld [vmem:[%s1061_s1 + $0x48] sm:$0xff]  ;;  %v272_v43 = vpack.c.bf16 %v173_v40, %v172_v37  ;;  %v156_v44 = vld [vmem:[%s1061_s1 + $0x140] sm:$0xff]  ;;  %v139_v47 = vld [vmem:[%s1061_s1 + $0xb8] sm:$0xff] }
   0xc   :  { %544 = vmatprep.subr.bf16.mxu1 %v273_v30  ;;  %v157_v45 = vld [vmem:[%s1061_s1 + $0x148] sm:$0xff]  ;;  %v170_v48 = vld [vmem:[%s1061_s1 + $0x1b0] sm:$0xff]  ;;  %v171_v49 = vld [vmem:[%s1061_s1 + $0x1b8] sm:$0xff]  ;;  %v248_v50 = vpack.c.bf16 %v125_v42, %v124_v41  ;;  %v255_v55 = vpack.c.bf16 %v139_v47, %v138_v46 }
   0xd   :  { %v264_v54 = vpack.c.bf16 %v157_v45, %v156_v44  ;;  %v122_v56 = vld [vmem:[%s1061_s1 + $0x30] sm:$0xff]  ;;  %v123_v57 = vld [vmem:[%s1061_s1 + $0x38] sm:$0xff]  ;;  %v271_v59 = vpack.c.bf16 %v171_v49, %v170_v48  ;;  %v136_v61 = vld [vmem:[%s1061_s1 + $0xa0] sm:$0xff] }
   0xe   :  { %523 = vmatpush3.bf16.msra.mxu0 %v249_v34  ;;  %v154_v58 = vld [vmem:[%s1061_s1 + $0x130] sm:$0xff]  ;;  %v155_v60 = vld [vmem:[%s1061_s1 + $0x138] sm:$0xff]  ;;  %v137_v62 = vld [vmem:[%s1061_s1 + $0xa8] sm:$0xff]  ;;  %v247_v1 = vpack.c.bf16 %v123_v57, %v122_v56 }
   0xf   :  { %545 = vmatpush3.bf16.msra.mxu1 %v265_v38  ;;  %524 = vmatprep.subr.bf16.mxu0 %v256_v39  ;;  %v168_v63 = vld [vmem:[%s1061_s1 + $0x1a0] sm:$0xff]  ;;  %v169_v0 = vld [vmem:[%s1061_s1 + $0x1a8] sm:$0xff]  ;;  %v263_v6 = vpack.c.bf16 %v155_v60, %v154_v58  ;;  %v254_v7 = vpack.c.bf16 %v137_v62, %v136_v61  ;;  %v134_v10 = vld [vmem:[%s1061_s1 + $0x90] sm:$0xff] }
  0x10   :  { %546 = vmatprep.subr.bf16.mxu1 %v272_v43  ;;  %v120_v2 = vld [vmem:[%s1061_s1 + $0x20] sm:$0xff]  ;;  %v121_v3 = vld [vmem:[%s1061_s1 + $0x28] sm:$0xff]  ;;  %v270_v11 = vpack.c.bf16 %v169_v0, %v168_v63  ;;  %v135_v12 = vld [vmem:[%s1061_s1 + $0x98] sm:$0xff] }
  0x11   :  { %v152_v8 = vld [vmem:[%s1061_s1 + $0x120] sm:$0xff]  ;;  %v153_v9 = vld [vmem:[%s1061_s1 + $0x128] sm:$0xff]  ;;  %v166_v13 = vld [vmem:[%s1061_s1 + $0x190] sm:$0xff]  ;;  %v246_v18 = vpack.c.bf16 %v121_v3, %v120_v2  ;;  %v253_v24 = vpack.c.bf16 %v135_v12, %v134_v10 }
  0x12   :  { %525 = vmatpush3.bf16.msra.mxu0 %v248_v50  ;;  %v167_v14 = vld [vmem:[%s1061_s1 + $0x198] sm:$0xff]  ;;  %v118_v15 = vld [vmem:[%s1061_s1 + $0x10] sm:$0xff]  ;;  %v132_v20 = vld [vmem:[%s1061_s1 + $0x80] sm:$0xff]  ;;  %v262_v23 = vpack.c.bf16 %v153_v9, %v152_v8 }
  0x13   :  { %547 = vmatpush3.bf16.msra.mxu1 %v264_v54  ;;  %526 = vmatprep.subr.bf16.mxu0 %v255_v55  ;;  %v119_v16 = vld [vmem:[%s1061_s1 + $0x18] sm:$0xff]  ;;  %v150_v17 = vld [vmem:[%s1061_s1 + $0x110] sm:$0xff]  ;;  %v133_v21 = vld [vmem:[%s1061_s1 + $0x88] sm:$0xff]  ;;  %v269_v27 = vpack.c.bf16 %v167_v14, %v166_v13 }
  0x14   :  { %548 = vmatprep.subr.bf16.mxu1 %v271_v59  ;;  %v151_v19 = vld [vmem:[%s1061_s1 + $0x118] sm:$0xff]  ;;  %v164_v25 = vld [vmem:[%s1061_s1 + $0x180] sm:$0xff]  ;;  %v165_v26 = vld [vmem:[%s1061_s1 + $0x188] sm:$0xff]  ;;  %v245_v32 = vpack.c.bf16 %v119_v16, %v118_v15  ;;  %v252_v34 = vpack.c.bf16 %v133_v21, %v132_v20 }
  0x15   :  { %v607_v28 = vld [vmem:[%s1060_s0] ss:$16 sps:$4 sm:$0xff]   ;;  %v611_v30 = vld [vmem:[%s1060_s0 + $0x4] ss:$16 sps:$4 sm:$0xff]   ;;  %v261_v33 = vpack.c.bf16 %v151_v19, %v150_v17  ;;  %v117_v37 = vld [vmem:[%s1061_s1 + $0x8] sm:$0xff]  ;;  %v268_v43 = vpack.c.bf16 %v165_v26, %v164_v25 }
  0x16   :  { %527 = vmatpush3.bf16.msra.mxu0 %v247_v1  ;;  %v609_v29 = vld [vmem:[%s1060_s0 + $0x20] ss:$16 sps:$4 sm:$0xff]   ;;  %v612_v31 = vld [vmem:[%s1060_s0 + $0x24] ss:$16 sps:$4 sm:$0xff]   ;;  %v38_v36 = vrot.slane %v607_v28, %v813_v22  ;;  %v149_v39 = vld [vmem:[%s1061_s1 + $0x108] sm:$0xff]  ;;  %v45_v41 = vrot.slane %v611_v30, %v813_v22 }
  0x17   :  { %549 = vmatpush3.bf16.msra.mxu1 %v263_v6  ;;  %528 = vmatprep.subr.bf16.mxu0 %v254_v7  ;;  %v116_v35 = vld [vmem:[%s1061_s1] sm:$0xff]  ;;  %v52_v40 = vrot.slane %v609_v29, %v813_v22  ;;  %v59_v42 = vrot.slane %v612_v31, %v813_v22  ;;  %v210_v44 = vld [vmem:[%s1061_s1 + $0x2f0] sm:$0xff]  ;;  %v211_v45 = vld [vmem:[%s1061_s1 + $0x2f8] sm:$0xff] }
  0x18   :  { %550 = vmatprep.subr.bf16.mxu1 %v270_v11  ;;  %v148_v38 = vld [vmem:[%s1061_s1 + $0x100] sm:$0xff]  ;;  %v242_v49 = vld [vmem:[%s1061_s1 + $0x3f0] sm:$0xff]  ;;  %v243_v50 = vld [vmem:[%s1061_s1 + $0x3f8] sm:$0xff]  ;;  %v244_v51 = vpack.c.bf16 %v117_v37, %v116_v35  ;;  %v291_v56 = vpack.c.bf16 %v211_v45, %v210_v44 }
  0x19   :  { %v61_v46 = vcombine.high %v38_v36, %v52_v40  ;;  %v63_v47 = vcombine.high %v45_v41, %v59_v42  ;;  %v60_v48 = vcombine.low %v38_v36, %v52_v40  ;;  %v260_v52 = vpack.c.bf16 %v149_v39, %v148_v38  ;;  %v194_v57 = vld [vmem:[%s1061_s1 + $0x270] sm:$0xff]  ;;  %v195_v58 = vld [vmem:[%s1061_s1 + $0x278] sm:$0xff]  ;;  %v208_v62 = vld [vmem:[%s1061_s1 + $0x2e0] sm:$0xff] }
  0x1a   :  { %529 = vmatpush3.bf16.msra.mxu0 %v246_v18  ;;  %v62_v53 = vcombine.low %v45_v41, %v59_v42  ;;  %v226_v59 = vld [vmem:[%s1061_s1 + $0x370] sm:$0xff]  ;;  %v307_v60 = vpack.c.bf16 %v243_v50, %v242_v49  ;;  %v227_v61 = vld [vmem:[%s1061_s1 + $0x378] sm:$0xff]  ;;  %v209_v63 = vld [vmem:[%s1061_s1 + $0x2e8] sm:$0xff]  ;;  %v283_v4 = vpack.c.bf16 %v195_v58, %v194_v57 }
  0x1b   :  { %551 = vmatpush3.bf16.msra.mxu1 %v262_v23  ;;  %530 = vmatprep.subr.bf16.mxu0 %v253_v24  ;;  %v109_v54 = vpack.c.bf16 %v61_v46, %v61_v46  ;;  %v111_v55 = vpack.c.bf16 %v63_v47, %v63_v47  ;;  %v108_v0 = vpack.c.bf16 %v60_v48, %v60_v48  ;;  %v240_v1 = vld [vmem:[%s1061_s1 + $0x3e0] sm:$0xff]  ;;  %v241_v2 = vld [vmem:[%s1061_s1 + $0x3e8] sm:$0xff]  ;;  %v206_v12 = vld [vmem:[%s1061_s1 + $0x2d0] sm:$0xff] }
  0x1c   :  { %552 = vmatprep.subr.bf16.mxu1 %v269_v27  ;;  %v110_v3 = vpack.c.bf16 %v62_v53, %v62_v53  ;;  %v299_v5 = vpack.c.bf16 %v227_v61, %v226_v59  ;;  %v290_v6 = vpack.c.bf16 %v209_v63, %v208_v62  ;;  %v192_v7 = vld [vmem:[%s1061_s1 + $0x260] sm:$0xff]  ;;  %v193_v8 = vld [vmem:[%s1061_s1 + $0x268] sm:$0xff]  ;;  %v306_v10 = vpack.c.bf16 %v241_v2, %v240_v1  ;;  %v207_v13 = vld [vmem:[%s1061_s1 + $0x2d8] sm:$0xff] }
  0x1d   :  { %340 = vmatprep.mubr.bf16.mxu0 %v109_v54  ;;  %380 = vmatprep.mubr.bf16.mxu1 %v111_v55  ;;  %v224_v9 = vld [vmem:[%s1061_s1 + $0x360] sm:$0xff]  ;;  %v225_v11 = vld [vmem:[%s1061_s1 + $0x368] sm:$0xff]  ;;  %v238_v14 = vld [vmem:[%s1061_s1 + $0x3d0] sm:$0xff]  ;;  %v282_v16 = vpack.c.bf16 %v193_v8, %v192_v7  ;;  %v289_v18 = vpack.c.bf16 %v207_v13, %v206_v12 }
  0x1e   :  { %531 = vmatpush3.bf16.msra.mxu0 %v245_v32  ;;  %v239_v15 = vld [vmem:[%s1061_s1 + $0x3d8] sm:$0xff]  ;;  %v298_v17 = vpack.c.bf16 %v225_v11, %v224_v9  ;;  %v190_v19 = vld [vmem:[%s1061_s1 + $0x250] sm:$0xff]  ;;  %v204_v25 = vld [vmem:[%s1061_s1 + $0x2c0] sm:$0xff] }
  0x1f   :  { %553 = vmatpush3.bf16.msra.mxu1 %v261_v33  ;;  %532 = vmatprep.subr.bf16.mxu0 %v252_v34  ;;  %v191_v20 = vld [vmem:[%s1061_s1 + $0x258] sm:$0xff]  ;;  %v222_v21 = vld [vmem:[%s1061_s1 + $0x350] sm:$0xff]  ;;  %v305_v23 = vpack.c.bf16 %v239_v15, %v238_v14  ;;  %v205_v26 = vld [vmem:[%s1061_s1 + $0x2c8] sm:$0xff] }
  0x20   :  { %554 = vmatprep.subr.bf16.mxu1 %v268_v43  ;;  %v223_v24 = vld [vmem:[%s1061_s1 + $0x358] sm:$0xff]  ;;  %v236_v27 = vld [vmem:[%s1061_s1 + $0x3c0] sm:$0xff]  ;;  %v237_v28 = vld [vmem:[%s1061_s1 + $0x3c8] sm:$0xff]  ;;  %v281_v29 = vpack.c.bf16 %v191_v20, %v190_v19  ;;  %v288_v33 = vpack.c.bf16 %v205_v26, %v204_v25 }
  0x21   :  { %v188_v30 = vld [vmem:[%s1061_s1 + $0x240] sm:$0xff]  ;;  %v189_v31 = vld [vmem:[%s1061_s1 + $0x248] sm:$0xff]  ;;  %v297_v32 = vpack.c.bf16 %v223_v24, %v222_v21  ;;  %v202_v36 = vld [vmem:[%s1061_s1 + $0x2b0] sm:$0xff]  ;;  %v304_v37 = vpack.c.bf16 %v237_v28, %v236_v27 }
  0x22   :  { %533 = vmatpush3.bf16.msra.mxu0 %v244_v51  ;;  %v220_v34 = vld [vmem:[%s1061_s1 + $0x340] sm:$0xff]  ;;  %v221_v35 = vld [vmem:[%s1061_s1 + $0x348] sm:$0xff]  ;;  %v203_v38 = vld [vmem:[%s1061_s1 + $0x2b8] sm:$0xff]  ;;  %v280_v44 = vpack.c.bf16 %v189_v31, %v188_v30 }
  0x23   :  { %555 = vmatpush3.bf16.msra.mxu1 %v260_v52  ;;  %562 = vmatprep.subr.bf16.mxu0 %v291_v56  ;;  %v234_v39 = vld [vmem:[%s1061_s1 + $0x3b0] sm:$0xff]  ;;  %v235_v40 = vld [vmem:[%s1061_s1 + $0x3b8] sm:$0xff]  ;;  %v200_v46 = vld [vmem:[%s1061_s1 + $0x2a0] sm:$0xff]  ;;  %v296_v48 = vpack.c.bf16 %v221_v35, %v220_v34  ;;  %v287_v49 = vpack.c.bf16 %v203_v38, %v202_v36 }
  0x24   :  { %584 = vmatprep.subr.bf16.mxu1 %v307_v60  ;;  %v186_v41 = vld [vmem:[%s1061_s1 + $0x230] sm:$0xff]  ;;  %v187_v42 = vld [vmem:[%s1061_s1 + $0x238] sm:$0xff]  ;;  %v201_v47 = vld [vmem:[%s1061_s1 + $0x2a8] sm:$0xff]  ;;  %v303_v52 = vpack.c.bf16 %v235_v40, %v234_v39 }
  0x25   :  { %341 = vmatmul.mubr.bf16.vlgmr.msra.gmra.mxu0 %v108_v0  ;;  %v218_v43 = vld [vmem:[%s1061_s1 + $0x330] sm:$0xff]  ;;  %v219_v45 = vld [vmem:[%s1061_s1 + $0x338] sm:$0xff]  ;;  %v232_v50 = vld [vmem:[%s1061_s1 + $0x3a0] sm:$0xff]  ;;  %v279_v57 = vpack.c.bf16 %v187_v42, %v186_v41  ;;  %v286_v59 = vpack.c.bf16 %v201_v47, %v200_v46 }
  0x26   :  { %381 = vmatmul.mubr.bf16.vlgmr.msra.gmra.mxu1 %v110_v3  ;;  %563 = vmatpush3.bf16.msra.mxu0 %v283_v4  ;;  %v233_v51 = vld [vmem:[%s1061_s1 + $0x3a8] sm:$0xff]  ;;  %v295_v58 = vpack.c.bf16 %v219_v45, %v218_v43  ;;  %v184_v60 = vld [vmem:[%s1061_s1 + $0x220] sm:$0xff]  ;;  %v230_v7 = vld [vmem:[%s1061_s1 + $0x390] sm:$0xff] }
  0x27   :  { %585 = vmatpush3.bf16.msra.mxu1 %v299_v5  ;;  %564 = vmatprep.subr.bf16.mxu0 %v290_v6  ;;  %v613_v53 = vld [vmem:[%s1060_s0 + $0x8] ss:$16 sps:$4 sm:$0xff]   ;;  %v617_v55 = vld [vmem:[%s1060_s0 + $0xc] ss:$16 sps:$4 sm:$0xff]   ;;  %v216_v63 = vld [vmem:[%s1061_s1 + $0x320] sm:$0xff]  ;;  %v302_v4 = vpack.c.bf16 %v233_v51, %v232_v50 }
  0x28   :  { %586 = vmatprep.subr.bf16.mxu1 %v306_v10  ;;  %v615_v54 = vld [vmem:[%s1060_s0 + $0x28] ss:$16 sps:$4 sm:$0xff]   ;;  %v618_v56 = vld [vmem:[%s1060_s0 + $0x2c] ss:$16 sps:$4 sm:$0xff]   ;;  %v74_v61 = vrot.slane %v613_v53, %v813_v22  ;;  %v81_v2 = vrot.slane %v617_v55, %v813_v22  ;;  %v198_v5 = vld [vmem:[%s1061_s1 + $0x290] sm:$0xff] }
  0x29   :  { %v185_v62 = vld [vmem:[%s1061_s1 + $0x228] sm:$0xff]  ;;  %v88_v1 = vrot.slane %v615_v54, %v813_v22  ;;  %v95_v3 = vrot.slane %v618_v56, %v813_v22  ;;  %v199_v6 = vld [vmem:[%s1061_s1 + $0x298] sm:$0xff]  ;;  %v182_v13 = vld [vmem:[%s1061_s1 + $0x210] sm:$0xff] }
  0x2a   :  { %565 = vmatpush3.bf16.msra.mxu0 %v282_v16  ;;  %v217_v0 = vld [vmem:[%s1061_s1 + $0x328] sm:$0xff]  ;;  %v231_v8 = vld [vmem:[%s1061_s1 + $0x398] sm:$0xff]  ;;  %v278_v10 = vpack.c.bf16 %v185_v62, %v184_v60  ;;  %v285_v12 = vpack.c.bf16 %v199_v6, %v198_v5  ;;  %v214_v15 = vld [vmem:[%s1061_s1 + $0x310] sm:$0xff] }
  0x2b   :  { %587 = vmatpush3.bf16.msra.mxu1 %v298_v17  ;;  %566 = vmatprep.subr.bf16.mxu0 %v289_v18  ;;  %v97_v9 = vcombine.high %v74_v61, %v88_v1  ;;  %v99_v22 = vcombine.high %v81_v2, %v95_v3  ;;  %v294_v11 = vpack.c.bf16 %v217_v0, %v216_v63  ;;  %v183_v14 = vld [vmem:[%s1061_s1 + $0x218] sm:$0xff]  ;;  %v196_v20 = vld [vmem:[%s1061_s1 + $0x280] sm:$0xff]  ;;  %v197_v21 = vld [vmem:[%s1061_s1 + $0x288] sm:$0xff] }
  0x2c   :  { %588 = vmatprep.subr.bf16.mxu1 %v305_v23  ;;  %v301_v18 = vpack.c.bf16 %v231_v8, %v230_v7  ;;  %v215_v19 = vld [vmem:[%s1061_s1 + $0x318] sm:$0xff]  ;;  %v228_v23 = vld [vmem:[%s1061_s1 + $0x380] sm:$0xff]  ;;  %v229_v24 = vld [vmem:[%s1061_s1 + $0x388] sm:$0xff]  ;;  %v277_v25 = vpack.c.bf16 %v183_v14, %v182_v13  ;;  %v284_v27 = vpack.c.bf16 %v197_v21, %v196_v20  ;;  %v98_v35 = vcombine.low %v81_v2, %v95_v3 }
  0x2d   :  { %v113_v16 = vpack.c.bf16 %v97_v9, %v97_v9  ;;  %v115_v17 = vpack.c.bf16 %v99_v22, %v99_v22  ;;  %v293_v26 = vpack.c.bf16 %v215_v19, %v214_v15  ;;  %v180_v28 = vld [vmem:[%s1061_s1 + $0x200] sm:$0xff]  ;;  %v300_v30 = vpack.c.bf16 %v229_v24, %v228_v23 }
  0x2e   :  { %567 = vmatpush3.bf16.msra.mxu0 %v281_v29  ;;  %v181_v29 = vld [vmem:[%s1061_s1 + $0x208] sm:$0xff]  ;;  %v212_v31 = vld [vmem:[%s1061_s1 + $0x300] sm:$0xff]  ;;  %v114_v38 = vpack.c.bf16 %v98_v35, %v98_v35 }
  0x2f   :  { %589 = vmatpush3.bf16.msra.mxu1 %v297_v32  ;;  %568 = vmatprep.subr.bf16.mxu0 %v288_v33  ;;  %v213_v32 = vld [vmem:[%s1061_s1 + $0x308] sm:$0xff]  ;;  %v96_v33 = vcombine.low %v74_v61, %v88_v1  ;;  %v276_v34 = vpack.c.bf16 %v181_v29, %v180_v28 }
  0x30   :  { %590 = vmatprep.subr.bf16.mxu1 %v304_v37  ;;  %420 = vmatprep.mubr.bf16.mxu0 %v113_v16  ;;  %v292_v36 = vpack.c.bf16 %v213_v32, %v212_v31 }
  0x31   :  { %460 = vmatprep.mubr.bf16.mxu1 %v115_v17  ;;  %v112_v37 = vpack.c.bf16 %v96_v33, %v96_v33 }
  0x32   :  { %569 = vmatpush3.bf16.msra.mxu0 %v280_v44 }
  0x33   :  { %591 = vmatpush3.bf16.msra.mxu1 %v296_v48  ;;  %570 = vmatprep.subr.bf16.mxu0 %v287_v49 }
  0x34   :  { %592 = vmatprep.subr.bf16.mxu1 %v303_v52 }
  0x36   :  { %571 = vmatpush3.bf16.msra.mxu0 %v279_v57 }
  0x37   :  { %593 = vmatpush3.bf16.msra.mxu1 %v295_v58  ;;  %572 = vmatprep.subr.bf16.mxu0 %v286_v59 }
  0x38   :  { %594 = vmatprep.subr.bf16.mxu1 %v302_v4 }
  0x3a   :  { %573 = vmatpush3.bf16.msra.mxu0 %v278_v10 }
  0x3b   :  { %595 = vmatpush3.bf16.msra.mxu1 %v294_v11  ;;  %574 = vmatprep.subr.bf16.mxu0 %v285_v12 }
  0x3c   :  { %596 = vmatprep.subr.bf16.mxu1 %v301_v18 }
  0x3e   :  { %575 = vmatpush3.bf16.msra.mxu0 %v277_v25 }
  0x3f   :  { %597 = vmatpush3.bf16.msra.mxu1 %v293_v26  ;;  %576 = vmatprep.subr.bf16.mxu0 %v284_v27 }
  0x40   :  { %598 = vmatprep.subr.bf16.mxu1 %v300_v30 }
  0x42   :  { %577 = vmatpush3.bf16.msra.mxu0 %v276_v34 }
  0x43   :  { %599 = vmatpush3.bf16.msra.mxu1 %v292_v36 }
  0x45   :  { %421 = vmatmul.mubr.bf16.vlgmr.msra.gmra.mxu0 %v112_v37 }
  0x46   :  { %461 = vmatmul.mubr.bf16.vlgmr.msra.gmra.mxu1 %v114_v38 }
  0xe5   :  { %v534_v39 = vpop.f32.mrf.mxu0 }
  0xe6   :  { %v556_v40 = vpop.f32.mrf.mxu1 }
  0xe7   :  { %v535_v41 = vpop.f32.mrf.mxu0 }
  0xe8   :  { %v557_v42 = vpop.f32.mrf.mxu1  ;;  %v536_v47 = vadd.f32 %v535_v41, %v534_v39 }
  0xe9   :  { %v537_v43 = vpop.f32.mrf.mxu0  ;;  %v558_v48 = vadd.f32 %v557_v42, %v556_v40 }
  0xea   :  { %v559_v44 = vpop.f32.mrf.mxu1 }
  0xeb   :  { %v538_v45 = vpop.f32.mrf.mxu0  ;;  %v383_v52 = vadd.f32 %v558_v48, %v536_v47 }
  0xec   :  { %v560_v46 = vpop.f32.mrf.mxu1 }
 0x105   :  { %v578_v49 = vpop.f32.mrf.mxu0 }
 0x106   :  { %v600_v50 = vpop.f32.mrf.mxu1 }
 0x107   :  { %v579_v51 = vpop.f32.mrf.mxu0 }
 0x108   :  { %v580_v53 = vadd.f32 %v579_v51, %v578_v49  ;;  %v601_v54 = vpop.f32.mrf.mxu1 }
 0x109   :  { %v581_v55 = vpop.f32.mrf.mxu0  ;;  %v602_v57 = vadd.f32 %v601_v54, %v600_v50 }
 0x10a   :  { %v423_v56 = vadd.f32 %v580_v53, %v383_v52  ;;  %v603_v58 = vpop.f32.mrf.mxu1 }
 0x10b   :  { %v582_v59 = vpop.f32.mrf.mxu0 }
 0x10c   :  { %v463_v60 = vadd.f32 %v602_v57, %v423_v56  ;;  %v604_v61 = vpop.f32.mrf.mxu1 }
 0x10e   :  { %v517_v62 = vmul.f32 -1.442695, %v463_v60 }
 0x110   :  { %619 = vpow2.f32 %v517_v62 }
 0x11d   :  { %v620_v63 = vpop.eup %619 }
 0x11e   :  { %v471_v0 = vadd.f32 1.0, %v620_v63 }
 0x120   :  { %621 = vrcp.f32 %v471_v0 }
 0x12d   :  { %v622_v1 = vpop.eup %621 }
 0x12e   :  { %475 = vst.msk [vmem:[#allocation2] sm:$0xff] %vm474_vm0, %v622_v1 }
 0x135   :  { %v494_v2 = vld [vmem:[#allocation2] sm:$0x3] }
 0x136   :  { %495 = vst [vmem:[%s1062_s2] sm:$0x3] %v494_v2 }

</bundles_post_ra>
